<compile_context>
chip_gen: v6e
topology: v6e:2x2x1
jax: 0.10.0
libtpu: 0.0.40
codegen_flags: <defaults>
</compile_context>

<pallas_src>
import functools

import jax
import jax.numpy as jnp
from jax.experimental import pallas as pl
from jax.experimental.pallas import tpu as pltpu


def _round_up(x, m):
    return ((x + m - 1) // m) * m


def _poisson_ll_kernel(x_ref, l_ref, f_ref, o_ref, acc_ref, *,
                       log_link, m_total, n_total, mask_rows, mask_cols):
    """Accumulates sum(x*log(lam) - lam) over the j (feature) axis per i-block."""
    i = pl.program_id(0)
    j = pl.program_id(1)
    tm, tn = x_ref.shape

    # Zero the per-i-block running accumulator at the start of the j sweep.
    @pl.when(j == 0)
    def _():
        acc_ref[...] = jnp.zeros_like(acc_ref)

    x = x_ref[...]
    if log_link:
        eta = jnp.dot(l_ref[...], f_ref[...], preferred_element_type=jnp.float32)
        # x * log(exp(eta)) == x * eta exactly: saves one EUP log per element and
        # avoids inf - inf -> NaN for large eta.
        ll = x * eta - jnp.exp(eta)
    else:
        # l_ref / f_ref already hold exp(L) / exp(F) (hoisted in the wrapper).
        lam = jnp.dot(l_ref[...], f_ref[...], preferred_element_type=jnp.float32)
        ll = x * jnp.log(lam) - lam

    # Mask out-of-range rows/cols (only emitted when shapes don't divide evenly).
    if mask_rows or mask_cols:
        valid = None
        if mask_rows:
            rows = jax.lax.broadcasted_iota(jnp.int32, (tm, tn), 0) + i * tm
            valid = rows < m_total
        if mask_cols:
            cols = jax.lax.broadcasted_iota(jnp.int32, (tm, tn), 1) + j * tn
            cvalid = cols < n_total
            valid = cvalid if valid is None else (valid & cvalid)
        ll = jnp.where(valid, ll, 0.0)

    # Reduce (tm, tn) -> (8, tn) with static-sliced VPU adds only (no cross-lane work),
    # then a single elementwise add into the VMEM accumulator.
    s = ll[0:8, :]
    for r in range(1, tm // 8):
        s = s + ll[r * 8:(r + 1) * 8, :]
    acc_ref[...] += s

    # Once per i-block: collapse sublanes and store a lane-dense (1, tn) partial.
    @pl.when(j == pl.num_programs(1) - 1)
    def _():
        o_ref[...] = jnp.sum(acc_ref[...], axis=0, keepdims=True)


def poisson_fa_nll(x, l, f, *, log_link=True, tm=256, tn=1024):
    """Negative log-likelihood of x under the Poisson factor model (L, F)."""
    x = x.astype(jnp.float32)
    l = l.astype(jnp.float32)
    f = f.astype(jnp.float32)
    M, N = x.shape
    K = l.shape[1]

    # Clamp tiles to the (padded) problem size; keep (8, 128) alignment.
    tm = max(8, min(int(tm), _round_up(M, 8)))
    tn = max(128, min(int(tn), _round_up(N, 128)))
    gm = pl.cdiv(M, tm)
    gn = pl.cdiv(N, tn)
    mask_rows = (M % tm) != 0
    mask_cols = (N % tn) != 0

    if not log_link:
        # exp(L), exp(F) are tiny (M*K, K*N); hoist out of the per-tile loop.
        l = jnp.exp(l)
        f = jnp.exp(f)

    kernel = functools.partial(
        _poisson_ll_kernel, log_link=log_link, m_total=M, n_total=N,
        mask_rows=mask_rows, mask_cols=mask_cols)

    cost = pl.CostEstimate(
        flops=2 * M * N * K,
        transcendentals=M * N,
        bytes_accessed=4 * (M * N + M * K * gn + K * N * gm + gm * tn))

    partials = pl.pallas_call(
        kernel,
        out_shape=jax.ShapeDtypeStruct((gm, tn), jnp.float32),
        grid_spec=pltpu.PrefetchScalarGridSpec(
            num_scalar_prefetch=0,
            grid=(gm, gn),
            in_specs=[
                pl.BlockSpec((tm, tn), lambda i, j: (i, j)),   # x tile
                pl.BlockSpec((tm, K), lambda i, j: (i, 0)),    # L rows (full rank K)
                pl.BlockSpec((K, tn), lambda i, j: (0, j)),    # F cols (full rank K)
            ],
            out_specs=pl.BlockSpec((1, tn), lambda i, j: (i, 0)),  # per-i partial sums
            scratch_shapes=[pltpu.VMEM((8, tn), jnp.float32)],
        ),
        compiler_params=pltpu.CompilerParams(
            dimension_semantics=("parallel", "arbitrary"),
            vmem_limit_bytes=64 * 1024 * 1024),  # explicit; actual use ~4 MiB (v7x-safe)
        cost_estimate=cost,
    )(x, l, f)

    # Parameter-independent term: computed once outside the kernel (pure data term,
    # can be cached across optimizer steps by the caller).
    # TODO(synk): implement lgamma in-kernel (Stirling/Lanczos) if streaming x twice
    # through XLA ever becomes the bottleneck.
    lgamma_const = jnp.sum(jax.lax.lgamma(x + 1.0))
    return -jnp.sum(partials) + lgamma_const


def poisson_fa_nll_ref(x, l, f, *, log_link=True):
    """Plain-JAX reference mirroring the PyTorch forward."""
    if log_link:
        lam = jnp.exp(l @ f)
    else:
        lam = jnp.exp(l) @ jnp.exp(f)
    return -jnp.sum(x * jnp.log(lam) - lam - jax.lax.lgamma(x + 1.0))


if __name__ == "__main__":
    # Shapes consistent with the module: x (n_samples, n_features),
    # l (n_samples, n_components), f (n_components, n_features).
    n_samples, n_features, n_components = 16, 256, 8

    key = jax.random.PRNGKey(0)
    k_x, k_l, k_f = jax.random.split(key, 3)
    l = jax.random.normal(k_l, (n_samples, n_components), dtype=jnp.float32)
    f = jax.random.normal(k_f, (n_components, n_features), dtype=jnp.float32)
    x = jax.random.poisson(k_x, lam=3.0,
                           shape=(n_samples, n_features)).astype(jnp.float32)

    nll = jax.block_until_ready(poisson_fa_nll(x, l, f, log_link=True))
    nll_ref = poisson_fa_nll_ref(x, l, f, log_link=True)
    assert jnp.allclose(nll, nll_ref, rtol=1e-4, atol=1e-2), (nll, nll_ref)

    nll2 = jax.block_until_ready(poisson_fa_nll(x, l, f, log_link=False))
    nll2_ref = poisson_fa_nll_ref(x, l, f, log_link=False)
    assert jnp.allclose(nll2, nll2_ref, rtol=1e-4, atol=1e-2), (nll2, nll2_ref)

    # Exercise the multi-tile grid + row/col masking path on a non-aligned shape.
    M2, N2 = 20, 300
    k2x, k2l, k2f = jax.random.split(jax.random.PRNGKey(1), 3)
    l2 = jax.random.normal(k2l, (M2, n_components), dtype=jnp.float32)
    f2 = jax.random.normal(k2f, (n_components, N2), dtype=jnp.float32)
    x2 = jax.random.poisson(k2x, lam=3.0, shape=(M2, N2)).astype(jnp.float32)
    nll3 = jax.block_until_ready(
        poisson_fa_nll(x2, l2, f2, log_link=True, tm=8, tn=128))
    nll3_ref = poisson_fa_nll_ref(x2, l2, f2, log_link=True)
    assert jnp.allclose(nll3, nll3_ref, rtol=1e-4, atol=1e-2), (nll3, nll3_ref)

    print("KERNEL_OK")
</pallas_src>

<mosaic_0001>
module attributes {stable_mosaic.version = 11 : i64} {
  func.func @_poisson_ll_kernel(%arg0: i32, %arg1: i32, %arg2: memref<16x256xf32, #tpu.memory_space<vmem>>, %arg3: memref<16x8xf32, #tpu.memory_space<vmem>>, %arg4: memref<8x256xf32, #tpu.memory_space<vmem>>, %arg5: memref<1x256xf32, #tpu.memory_space<vmem>>, %arg6: memref<8x256xf32, #tpu.memory_space<vmem>>) attributes {dimension_semantics = [#tpu.dimension_semantics<parallel>, #tpu.dimension_semantics<arbitrary>], iteration_bounds = array<i64: 1, 1>, scalar_prefetch = 0 : i64, scratch_operands = 1 : i64, tpu.core_type = #tpu.core_type<tc>, window_params = [{transform_indices = @transform_0, window_bounds = array<i64: 16, 256>}, {transform_indices = @transform_1, window_bounds = array<i64: 16, 8>}, {transform_indices = @transform_2, window_bounds = array<i64: 8, 256>}, {transform_indices = @transform_3, window_bounds = array<i64: 1, 256>}]} {
    %c0_i32 = arith.constant 0 : i32
    %0 = arith.cmpi eq, %arg1, %c0_i32 : i32
    %1 = arith.extui %0 : i1 to i32
    %c0_i32_0 = arith.constant 0 : i32
    %2 = arith.cmpi ne, %1, %c0_i32_0 : i32
    scf.if %2 {
      %cst_12 = arith.constant 0.000000e+00 : f32
      %19 = vector.broadcast %cst_12 : f32 to vector<8x256xf32>
      %c0_13 = arith.constant 0 : index
      %c0_14 = arith.constant 0 : index
      %20 = vector.load %arg6[%c0_13, %c0_14] : memref<8x256xf32, #tpu.memory_space<vmem>>, vector<8x256xf32>
      tpu.vector_store %arg6[%c0_13, %c0_14], %19 {strides = array<i32>} : memref<8x256xf32, #tpu.memory_space<vmem>>, vector<8x256xf32>,
    } else {
    }
    %c0 = arith.constant 0 : index
    %c0_1 = arith.constant 0 : index
    %3 = vector.load %arg2[%c0, %c0_1] : memref<16x256xf32, #tpu.memory_space<vmem>>, vector<16x256xf32>
    %c0_2 = arith.constant 0 : index
    %c0_3 = arith.constant 0 : index
    %4 = vector.load %arg3[%c0_2, %c0_3] : memref<16x8xf32, #tpu.memory_space<vmem>>, vector<16x8xf32>
    %c0_4 = arith.constant 0 : index
    %c0_5 = arith.constant 0 : index
    %5 = vector.load %arg4[%c0_4, %c0_5] : memref<8x256xf32, #tpu.memory_space<vmem>>, vector<8x256xf32>
    %cst = arith.constant dense<0.000000e+00> : vector<16x256xf32>
    %6 = tpu.matmul %4, %5, %cst {dimension_numbers = #tpu.dot_dimension_numbers<[1], [0], [0], [1], [0, 0, 1, 1], [], []>} : vector<16x8xf32>, vector<8x256xf32>, vector<16x256xf32> -> vector<16x256xf32>
    %7 = arith.mulf %3, %6 : vector<16x256xf32>
    %8 = math.exp %6 : vector<16x256xf32>
    %9 = arith.subf %7, %8 : vector<16x256xf32>
    %10 = vector.extract_strided_slice %9 {offsets = [0, 0], sizes = [8, 256], strides = [1, 1]} : vector<16x256xf32> to vector<8x256xf32>
    %11 = vector.extract_strided_slice %9 {offsets = [8, 0], sizes = [8, 256], strides = [1, 1]} : vector<16x256xf32> to vector<8x256xf32>
    %12 = arith.addf %10, %11 : vector<8x256xf32>
    %c0_6 = arith.constant 0 : index
    %c0_7 = arith.constant 0 : index
    %13 = vector.load %arg6[%c0_6, %c0_7] : memref<8x256xf32, #tpu.memory_space<vmem>>, vector<8x256xf32>
    %14 = arith.addf %13, %12 : vector<8x256xf32>
    %c0_8 = arith.constant 0 : index
    %c0_9 = arith.constant 0 : index
    %15 = vector.load %arg6[%c0_8, %c0_9] : memref<8x256xf32, #tpu.memory_space<vmem>>, vector<8x256xf32>
    tpu.vector_store %arg6[%c0_8, %c0_9], %14 {strides = array<i32>} : memref<8x256xf32, #tpu.memory_space<vmem>>, vector<8x256xf32>,
    %c0_i32_10 = arith.constant 0 : i32
    %16 = arith.cmpi eq, %arg1, %c0_i32_10 : i32
    %17 = arith.extui %16 : i1 to i32
    %c0_i32_11 = arith.constant 0 : i32
    %18 = arith.cmpi ne, %17, %c0_i32_11 : i32
    scf.if %18 {
      %c0_12 = arith.constant 0 : index
      %c0_13 = arith.constant 0 : index
      %19 = vector.load %arg6[%c0_12, %c0_13] : memref<8x256xf32, #tpu.memory_space<vmem>>, vector<8x256xf32>
      %cst_14 = arith.constant dense<0.000000e+00> : vector<256xf32>
      %20 = vector.multi_reduction <add>, %19, %cst_14 [0] : vector<8x256xf32> to vector<256xf32>
      %21 = vector.shape_cast %20 : vector<256xf32> to vector<1x256xf32>
      %c0_15 = arith.constant 0 : index
      %c0_16 = arith.constant 0 : index
      %22 = vector.load %arg5[%c0_15, %c0_16] : memref<1x256xf32, #tpu.memory_space<vmem>>, vector<1x256xf32>
      tpu.vector_store %arg5[%c0_15, %c0_16], %21 {strides = array<i32>} : memref<1x256xf32, #tpu.memory_space<vmem>>, vector<1x256xf32>,
    } else {
    }
    return
  }
  func.func @transform_0(%arg0: i32, %arg1: i32) -> (i32, i32) {
    %c0_i32 = arith.constant 0 : i32
    return %arg0, %arg1 : i32, i32
  }
  func.func @transform_1(%arg0: i32, %arg1: i32) -> (i32, i32) {
    %c0_i32 = arith.constant 0 : i32
    %c0_i32_0 = arith.constant 0 : i32
    return %arg0, %c0_i32 : i32, i32
  }
  func.func @transform_2(%arg0: i32, %arg1: i32) -> (i32, i32) {
    %c0_i32 = arith.constant 0 : i32
    %c0_i32_0 = arith.constant 0 : i32
    return %c0_i32, %arg1 : i32, i32
  }
  func.func @transform_3(%arg0: i32, %arg1: i32) -> (i32, i32) {
    %c0_i32 = arith.constant 0 : i32
    %c0_i32_0 = arith.constant 0 : i32
    return %arg0, %c0_i32 : i32, i32
  }
}

</mosaic_0001>

<bundles_post_ra>
// kernel: tpu_custom_call.1
= control target key start
LH: loop header
LB: loop body
LE: loop exit
PB: predicated region body
PF: predicated region fallthrough
CT: control target
= control target key end

     0   :  { %8 = vsyncpa [#allocation4], 0  ;;  %s312_s0 = inlined_call_operand.hbm [shape: f32[16,256], index: 0, kind: input, shape index: {}]   ;;  %s313_s1 = inlined_call_operand.vmem [shape: f32[16,8], index: 1, kind: input, shape index: {}]   ;;  %s314_s2 = inlined_call_operand.vmem [shape: f32[8,256], index: 2, kind: input, shape index: {}]   ;;  %s315_s3 = inlined_call_operand.hbm [shape: f32[1,256], index: 3, kind: output, shape index: {}]  }
   0x1   :  { %9 = vsyncpa [#allocation5], 0  ;;  %s268_s12 = smov [#allocation3]  }
   0x2   :  { %s15_s13 = sshll.u32 %s268_s12, 4  ;;  %s16_s13 = int_to_ptr.vmem [resolvable:$true] %s15_s13 }
   0x3   :  { %s232_s14 = scalar_lea.vmem %s16_s13, 512  ;;  %p237_p1 = scmp.lt.s32.totalorder %s16_s13, %s16_s13 }
   0x4   :  { %p233_p0 = scmp.ne.s32.totalorder %s16_s13, %s232_s14  ;;  %p238_p2 = scmp.lt.s32.totalorder %s232_s14, %s232_s14 }
   0x6   :  { %p239_p3 = por %p238_p2, %p237_p1 }
   0x8   :  { %p240_p4 = pnand %p239_p3, %p233_p0 }
   0xa   :  { %243 = shalt.err (!%p240_p4)
}
   0xb   :  { %s269_s15 = smov 256   ;;  %s270_s16 = smov 16  }
   0xc   :  { %21 = dma.hbm_to_vmem [thread:$0]  %s312_s0, 512, %s16_s13, [#allocation4], %s269_s15, %s269_s15, %s270_s16  }
   0xd   :  { %264 = dma.done.wait [#allocation4], 512  }
   0xe   :  { %265 = vsyncadd [#allocation4], 4294966784  ;;  %v271_v0 = vmov 0.0   ;;  %v42_v1 = vld [vmem:[%s314_s2 + $0x8] sm:$0xff]  ;;  %v41_v2 = vld [vmem:[%s314_s2] sm:$0xff]  ;;  %vm43_vm0 = vcmask 64512   ;;  %v174_v38 = vlaneseq }
   0xf   :  { %114 = vmatprep.mubr.f32.mxu0 %v271_v0  ;;  %120 = vmatprep.mubr.f32.mxu1 %v271_v0  ;;  %v39_v3 = vld [vmem:[%s313_s1] sm:$0xff]  ;;  %v40_v4 = vld [vmem:[%s313_s1 + $0x8] sm:$0xff]  ;;  %v37_v14 = vld [vmem:[#allocation3 + $0x10] sm:$0xff]  ;;  %v272_v36 = vmov 1966171168   ;;  %s273_s1 = smov [#allocation6]  }
  0x10   :  { %80 = vmatprep.subr.mxu0 %v42_v1  ;;  %208 = vmatprep.subr.mxu1 %v42_v1  ;;  %v35_v13 = vld [vmem:[#allocation3] sm:$0xff]  ;;  %v36_v15 = vld [vmem:[#allocation3 + $0x8] sm:$0xff]  ;;  %v38_v17 = vld [vmem:[#allocation3 + $0x18] sm:$0xff]  ;;  %v172_v37 = vunpack.c.l.s4 %v272_v36  ;;  %v175_v44 = vshrl.u32 %v174_v38, 7  ;;  %s197_s2 = sshll.u32 %s273_s1, 4  ;;  %vm188_vm1 = vcmp.lt.s32.totalorder %v174_v38, 256  ;;  %s198_s2 = int_to_ptr.vmem [resolvable:$true] %s197_s2 }
  0x11   :  { %81 = vmatpush1.msra.mxu0 %v41_v2  ;;  %209 = vmatpush1.msra.mxu1 %v41_v2  ;;  %s244_s26 = scalar_lea.vmem %s198_s2, 32  ;;  %p249_p6 = scmp.lt.s32.totalorder %s198_s2, %s198_s2 }
  0x12   :  { %206 = vmatmul.mubr.msk.f32.vlgmr.msra.gmra.mxu0 %vm43_vm0, %v39_v3  ;;  %207 = vmatmul.mubr.msk.f32.vlgmr.msra.gmra.mxu1 %vm43_vm0, %v40_v4  ;;  %v173_v43 = vunpack.c.0.s8 %v172_v37  ;;  %p245_p5 = scmp.ne.s32.totalorder %s198_s2, %s244_s26  ;;  %p250_p7 = scmp.lt.s32.totalorder %s244_s26, %s244_s26 }
  0x14   :  { %v176_v48 = vsub.s32 %v173_v43, %v175_v44  ;;  %p251_p8 = por %p250_p7, %p249_p6 }
  0x16   :  { %p252_p9 = pnand %p251_p8, %p245_p5 }
  0xd2   :  { %v116_v5 = vpop.f32.mrf.mxu0  ;;  %v122_v6 = vpop.f32.mrf.mxu1 }
  0xd3   :  { %v131_v7 = vmul.f32 1.442695, %v116_v5  ;;  %v135_v8 = vmul.f32 1.442695, %v122_v6  ;;  %v127_v16 = vmul.f32 %v116_v5, %v35_v13  ;;  %v129_v19 = vmul.f32 %v122_v6, %v37_v14 }
  0xd4   :  { %v118_v9 = vpop.f32.mrf.mxu0  ;;  %v124_v10 = vpop.f32.mrf.mxu1 }
  0xd5   :  { %216 = vpow2.f32 %v131_v7  ;;  %v133_v11 = vmul.f32 1.442695, %v118_v9  ;;  %v137_v12 = vmul.f32 1.442695, %v124_v10  ;;  %v128_v22 = vmul.f32 %v118_v9, %v36_v15 }
  0xd6   :  { %218 = vpow2.f32 %v135_v8  ;;  %v130_v25 = vmul.f32 %v124_v10, %v38_v17 }
  0xd7   :  { %220 = vpow2.f32 %v133_v11 }
  0xd8   :  { %222 = vpow2.f32 %v137_v12 }
  0xe2   :  { %v217_v18 = vpop.eup %216 }
  0xe3   :  { %v219_v20 = vpop.eup %218  ;;  %v139_v21 = vsub.f32 %v127_v16, %v217_v18 }
  0xe4   :  { %v221_v23 = vpop.eup %220  ;;  %v141_v24 = vsub.f32 %v129_v19, %v219_v20 }
  0xe5   :  { %v223_v26 = vpop.eup %222  ;;  %v140_v27 = vsub.f32 %v128_v22, %v221_v23 }
  0xe6   :  { %v143_v28 = vadd.f32 %v141_v24, %v139_v21  ;;  %v142_v29 = vsub.f32 %v130_v25, %v223_v26 }
  0xe8   :  { %v156_v30 = vrot.slane %v143_v28, 4  ;;  %v144_v31 = vadd.f32 %v142_v29, %v140_v27 }
  0xea   :  { %v157_v32 = vadd.f32 %v156_v30, %v143_v28  ;;  %v162_v33 = vrot.slane %v144_v31, 4 }
  0xec   :  { %v158_v34 = vrot.slane %v157_v32, 2  ;;  %v163_v35 = vadd.f32 %v162_v33, %v144_v31 }
  0xee   :  { %v159_v39 = vadd.f32 %v158_v34, %v157_v32  ;;  %v164_v40 = vrot.slane %v163_v35, 2 }
  0xf0   :  { %v160_v41 = vrot.slane %v159_v39, 1  ;;  %v165_v42 = vadd.f32 %v164_v40, %v163_v35 }
  0xf2   :  { %v166_v45 = vrot.slane %v165_v42, 1  ;;  %v161_v46 = vadd.f32 %v160_v41, %v159_v39 }
  0xf4   :  { %v167_v47 = vadd.f32 %v166_v45, %v165_v42 }
  0xf6   :  { %v170_v49 = vcombine.low %v161_v46, %v167_v47 }
  0xf8   :  { %v177_v50 = vrot.slane %v170_v49, %v176_v48 }
  0xfa   :  { %v184_v51 = vrot.slane %v177_v50, %v176_v48 }
  0xfc   :  { %190 = vst.msk [vmem:[#allocation6] sm:$0x3] %vm188_vm1, %v184_v51 }
  0xfd   :  { %255 = shalt.err (!%p252_p9)
}
  0xfe   :  { %200 = dma.vmem_to_hbm [thread:$0]  %s198_s2, 32, %s315_s3, [#allocation5]  }
  0xff   :  { %266 = dma.done.wait [#allocation5], 32  }
 0x100   :  { %267 = vsyncadd [#allocation5], 4294967264 }
 0x101   :  { %204 = vsyncpa [#allocation4], 1 }
 0x102   :  { %205 = vsyncpa [#allocation5], 1 }

</bundles_post_ra>
